<compile_context>
chip_gen: v7x
topology: tpu7x:2x2x1
jax: 0.10.0
libtpu: 0.0.40
codegen_flags: <defaults>
</compile_context>

<pallas_src>
import functools

import numpy as np
import jax
import jax.numpy as jnp
from jax.experimental import pallas as pl
from jax.experimental.pallas import tpu as pltpu


# ----------------------------------------------------------------------------
# Kernel 1: row-tiled matmul + bias (hoisted input projections, h2s linear)
# ----------------------------------------------------------------------------
def _matmul_bias_kernel(x_ref, w_ref, b_ref, o_ref):
    o_ref[...] = (jnp.dot(x_ref[...], w_ref[...],
                          preferred_element_type=jnp.float32) + b_ref[...])


def matmul_bias(x, w, b, *, max_tile_n=256):
    """(N, K) @ (K, G) + b, tiled over rows; output stores are lane-dense."""
    N, K = x.shape
    G = w.shape[1]
    tile_n = min(max_tile_n, ((N + 7) // 8) * 8)
    n_pad = ((N + tile_n - 1) // tile_n) * tile_n
    if n_pad != N:
        x = jnp.concatenate([x, jnp.zeros((n_pad - N, K), x.dtype)], axis=0)
    out = pl.pallas_call(
        _matmul_bias_kernel,
        out_shape=jax.ShapeDtypeStruct((n_pad, G), jnp.float32),
        grid_spec=pltpu.PrefetchScalarGridSpec(
            num_scalar_prefetch=0,
            grid=(n_pad // tile_n,),
            in_specs=[
                pl.BlockSpec((tile_n, K), lambda i: (i, 0)),
                pl.BlockSpec((K, G), lambda i: (0, 0)),
                pl.BlockSpec((1, G), lambda i: (0, 0)),
            ],
            out_specs=pl.BlockSpec((tile_n, G), lambda i: (i, 0)),
        ),
        compiler_params=pltpu.CompilerParams(
            dimension_semantics=("parallel",)),
    )(x, w, b.reshape(1, G))
    return out[:N]


# ----------------------------------------------------------------------------
# Kernel 2: LSTM recurrence. grid = (direction, T_pad // tile_t); each grid
# step advances tile_t timesteps of one direction; only h @ W_hh is inside
# the serial loop (input projection already folded into gx).
# ----------------------------------------------------------------------------
def _lstm_rec_kernel(gx_ref, whh_ref, mask_ref, y_ref, h_scr, c_scr,
                     *, tile_t, H):
    @pl.when(pl.program_id(1) == 0)            # new direction -> zero state
    def _():
        h_scr[...] = jnp.zeros_like(h_scr)
        c_scr[...] = jnp.zeros_like(c_scr)

    whh = whh_ref[...]                         # (H, 4H), loaded once per tile

    def step(i, carry):
        h, c = carry
        gates = gx_ref[i] + jnp.dot(h, whh, preferred_element_type=jnp.float32)
        ig = jax.lax.logistic(gates[:, 0:H])
        fg = jax.lax.logistic(gates[:, H:2 * H])
        gg = jnp.tanh(gates[:, 2 * H:3 * H])
        og = jax.lax.logistic(gates[:, 3 * H:4 * H])
        c_new = fg * c + ig * gg
        h_new = og * jnp.tanh(c_new)
        m = mask_ref[i]                        # (B, 1) float {0, 1}
        h_out = h + m * (h_new - h)            # frozen state on padded steps
        c_out = c + m * (c_new - c)
        y_ref[i] = m * h_new                   # zero output on padded steps
        return (h_out, c_out)

    h_fin, c_fin = jax.lax.fori_loop(
        0, tile_t, step, (h_scr[...], c_scr[...]), unroll=True)
    h_scr[...] = h_fin
    c_scr[...] = c_fin


def _bilstm_layer(x, msk2, w_ih_f, w_hh_f, b_f, w_ih_b, w_hh_b, b_b, *, tile_t):
    """One bidirectional LSTM layer.  x: [T_pad, B, D] f32,
    msk2: [2, T_pad, B, 1] f32 (fwd mask, time-flipped mask)."""
    T_pad, B, D = x.shape
    H4 = w_ih_f.shape[1]
    H = H4 // 4

    # fused, hoisted input projection for both directions (bf16 MXU, f32 acc)
    w_cat = jnp.concatenate([w_ih_f, w_ih_b], axis=1).astype(jnp.bfloat16)
    b_cat = jnp.concatenate([b_f, b_b])                       # (8H,)
    gates = matmul_bias(x.reshape(T_pad * B, D).astype(jnp.bfloat16),
                        w_cat, b_cat)                         # (T_pad*B, 8H) f32
    gates = gates.reshape(T_pad, B, 8 * H)

    # stack directions; backward direction runs on time-reversed gates/mask
    gx = jnp.stack([gates[..., :4 * H],
                    jnp.flip(gates[..., 4 * H:], axis=0)], axis=0)
    whh = jnp.stack([w_hh_f, w_hh_b], axis=0)                 # [2, H, 4H]

    kernel = functools.partial(_lstm_rec_kernel, tile_t=tile_t, H=H)
    y = pl.pallas_call(
        kernel,
        out_shape=jax.ShapeDtypeStruct((2, T_pad, B, H), jnp.float32),
        grid_spec=pltpu.PrefetchScalarGridSpec(
            num_scalar_prefetch=0,
            grid=(2, T_pad // tile_t),
            in_specs=[
                pl.BlockSpec((None, tile_t, B, 4 * H),
                             lambda d, t: (d, t, 0, 0)),      # gates_x tile
                pl.BlockSpec((None, H, 4 * H),
                             lambda d, t: (d, 0, 0)),          # W_hh (per dir)
                pl.BlockSpec((None, tile_t, B, 1),
                             lambda d, t: (d, t, 0, 0)),      # mask tile
            ],
            out_specs=pl.BlockSpec((None, tile_t, B, H),
                                   lambda d, t: (d, t, 0, 0)),
            scratch_shapes=[pltpu.VMEM((B, H), jnp.float32),   # h state
                            pltpu.VMEM((B, H), jnp.float32)],  # c state
        ),
        compiler_params=pltpu.CompilerParams(
            # direction axis parallel -> sharded across the 2 TCs on v7x;
            # harmless sequential loop on v5e/v6e.
            dimension_semantics=("parallel", "arbitrary")),
    )(gx, whh, msk2)

    y_f = y[0]
    y_b = jnp.flip(y[1], axis=0)               # back to original time order
    return jnp.concatenate([y_f, y_b], axis=-1)               # [T_pad, B, 2H]


def bilstm(x, lengths, layer_params, *, tile_t=8):
    """Multi-layer bidirectional LSTM over time-major x [T, B, D], zero init
    state, packed-sequence semantics via lengths."""
    T, B, _ = x.shape
    T_pad = ((T + tile_t - 1) // tile_t) * tile_t
    if T_pad != T:
        x = jnp.concatenate(
            [x, jnp.zeros((T_pad - T, B, x.shape[2]), x.dtype)], axis=0)
    mask = (jnp.arange(T_pad)[:, None] < lengths[None, :]
            ).astype(jnp.float32)[:, :, None]                 # [T_pad, B, 1]
    msk2 = jnp.stack([mask, jnp.flip(mask, axis=0)], axis=0)  # [2, T_pad, B, 1]

    h = x
    for layer in layer_params:
        h = _bilstm_layer(h, msk2, *layer["fwd"], *layer["bwd"], tile_t=tile_t)
    return h[:T]                                              # [T, B, 2H]


# ----------------------------------------------------------------------------
# Model pieces
# ----------------------------------------------------------------------------
def linear(x, w, b):
    """h2s linear with the narrow output padded to a lane-dense 128 slab."""
    K = x.shape[1]
    O = w.shape[1]
    O_pad = max(128, ((O + 127) // 128) * 128)
    w_p = jnp.zeros((K, O_pad), jnp.float32).at[:, :O].set(w)
    b_p = jnp.zeros((O_pad,), jnp.float32).at[:O].set(b)
    return matmul_bias(x, w_p, b_p)[:, :O]


def sentence_encoder(word_emb, sent_lengths, enc_params):
    """SentenceEncodingRNN-style: biLSTM over words, max-pool over valid steps."""
    out = bilstm(word_emb, sent_lengths, enc_params)          # [Tw, S, 2*H_enc]
    Tw = out.shape[0]
    valid = (jnp.arange(Tw)[:, None] < sent_lengths[None, :])[:, :, None]
    masked = jnp.where(valid, out, -jnp.inf)
    return jnp.max(masked, axis=0)                            # [S, 2*H_enc]


def model_forward(batch, params):
    """Mirrors Model.forward: encode sentences, doc-level biLSTM, h2s linear."""
    sentences_per_doc = [len(d) for d in batch]
    all_sents = [s for d in batch for s in d]
    lengths = [int(s.shape[0]) for s in all_sents]
    assert min(lengths) >= 1 and min(sentences_per_doc) >= 1, \
        "empty sentences / documents are not supported"
    max_len = max(lengths)
    S = len(all_sents)
    E = all_sents[0].shape[1]

    # pack sentences time-major [Tw, S, E] with one gather (no .at[].set loop)
    flat = jnp.concatenate(all_sents + [jnp.zeros((1, E), jnp.float32)], axis=0)
    pad_row = sum(lengths)
    gidx = np.full((max_len, S), pad_row, np.int32)
    off = 0
    for i, L in enumerate(lengths):
        gidx[:L, i] = np.arange(off, off + L)
        off += L
    big = flat[jnp.asarray(gidx)]                             # [Tw, S, E]
    sent_lens = jnp.asarray(np.array(lengths, np.int32))

    enc = sentence_encoder(big, sent_lens, params["enc"])     # [S, enc_dim]

    # pack documents [max_doc, B, enc_dim] with one gather
    B = len(batch)
    max_doc = max(sentences_per_doc)
    enc_dim = enc.shape[1]
    enc_p = jnp.concatenate([enc, jnp.zeros((1, enc_dim), enc.dtype)], axis=0)
    didx = np.full((max_doc, B), S, np.int32)
    off = 0
    for i, n in enumerate(sentences_per_doc):
        didx[:n, i] = np.arange(off, off + n)
        off += n
    docs = enc_p[jnp.asarray(didx)]                           # [max_doc, B, .]
    doc_lens = jnp.asarray(np.array(sentences_per_doc, np.int32))

    # sentence-level 2-layer bidirectional LSTM, zero initial state
    lstm_out = bilstm(docs, doc_lens, params["sent_lstm"])    # [max_doc, B, 2H]

    # padded_x[0:doc_len-1, i, :] per doc, original doc order, single gather
    flat_out = lstm_out.reshape(max_doc * B, -1)
    sel = []
    for i, n in enumerate(sentences_per_doc):
        sel.extend(t * B + i for t in range(n - 1))
    sentence_outputs = flat_out[jnp.asarray(np.array(sel, np.int32))]

    return linear(sentence_outputs, params["h2s_w"], params["h2s_b"])  # [., 2]


# ----------------------------------------------------------------------------
# Deterministic parameter init (PyTorch-style uniform(-1/sqrt(H), 1/sqrt(H)))
# ----------------------------------------------------------------------------
def init_lstm_params(key, input_size, hidden, num_layers):
    params = []
    bound = 1.0 / float(hidden) ** 0.5
    for l in range(num_layers):
        d_in = input_size if l == 0 else 2 * hidden
        layer = {}
        for dname in ("fwd", "bwd"):
            key, k1, k2, k3 = jax.random.split(key, 4)
            w_ih = jax.random.uniform(k1, (d_in, 4 * hidden), jnp.float32,
                                      -bound, bound)
            w_hh = jax.random.uniform(k2, (hidden, 4 * hidden), jnp.float32,
                                      -bound, bound)
            b = jax.random.uniform(k3, (4 * hidden,), jnp.float32,
                                   -bound, bound)
            layer[dname] = (w_ih, w_hh, b)
        params.append(layer)
    return params


if __name__ == "__main__":
    key = jax.random.PRNGKey(0)

    E = 16                  # word-embedding dim
    H_ENC, L_ENC = 16, 1    # sentence encoder hidden / layers -> enc dim 32
    H_SENT, L_SENT = 32, 2  # Model hidden / num_layers (small demo sizes)

    key, k_enc, k_sl, kw, kb = jax.random.split(key, 5)
    enc_params = init_lstm_params(k_enc, E, H_ENC, L_ENC)
    enc_dim = H_ENC * L_ENC * 2
    sent_lstm_params = init_lstm_params(k_sl, enc_dim, H_SENT, L_SENT)
    bound = 1.0 / float(2 * H_SENT) ** 0.5
    h2s_w = jax.random.uniform(kw, (2 * H_SENT, 2), jnp.float32, -bound, bound)
    h2s_b = jax.random.uniform(kb, (2,), jnp.float32, -bound, bound)
    params = {"enc": enc_params, "sent_lstm": sent_lstm_params,
              "h2s_w": h2s_w, "h2s_b": h2s_b}

    # batch: 2 documents with 3 and 5 sentences, variable sentence lengths
    sent_lengths = [[5, 3, 7], [4, 6, 2, 8, 5]]
    batch = []
    for lens in sent_lengths:
        doc = []
        for L in lens:
            key, sk = jax.random.split(key)
            doc.append(jax.random.normal(sk, (L, E), jnp.float32))
        batch.append(doc)

    out = model_forward(batch, params)
    out = jax.block_until_ready(out)

    expected_rows = sum(len(d) - 1 for d in batch)   # one logit row per boundary
    assert out.shape == (expected_rows, 2), out.shape
    assert bool(jnp.all(jnp.isfinite(out)))
    # TODO(synk): CrossEntropyLoss criterion is defined in __init__ but unused
    # in forward(); not implemented.
    print("KERNEL_OK")
</pallas_src>

<mosaic_0001>
module attributes {stable_mosaic.version = 11 : i64} {
  func.func @_matmul_bias_kernel(%arg0: i32, %arg1: memref<64x16xbf16, #tpu.memory_space<vmem>>, %arg2: memref<16x128xbf16, #tpu.memory_space<vmem>>, %arg3: memref<1x128xf32, #tpu.memory_space<vmem>>, %arg4: memref<64x128xf32, #tpu.memory_space<vmem>>) attributes {dimension_semantics = [#tpu.dimension_semantics<parallel>], iteration_bounds = array<i64: 1>, scalar_prefetch = 0 : i64, scratch_operands = 0 : i64, tpu.core_type = #tpu.core_type<tc>, window_params = [{transform_indices = @transform_0, window_bounds = array<i64: 64, 16>}, {pipeline_mode = #tpu.pipeline_mode<synchronous>, transform_indices = @transform_1, window_bounds = array<i64: 16, 128>}, {pipeline_mode = #tpu.pipeline_mode<synchronous>, transform_indices = @transform_2, window_bounds = array<i64: 1, 128>}, {transform_indices = @transform_3, window_bounds = array<i64: 64, 128>}]} {
    %c0 = arith.constant 0 : index
    %c0_0 = arith.constant 0 : index
    %0 = vector.load %arg1[%c0, %c0_0] : memref<64x16xbf16, #tpu.memory_space<vmem>>, vector<64x16xbf16>
    %c0_1 = arith.constant 0 : index
    %c0_2 = arith.constant 0 : index
    %1 = vector.load %arg2[%c0_1, %c0_2] : memref<16x128xbf16, #tpu.memory_space<vmem>>, vector<16x128xbf16>
    %cst = arith.constant dense<0.000000e+00> : vector<64x128xf32>
    %2 = tpu.matmul %0, %1, %cst {dimension_numbers = #tpu.dot_dimension_numbers<[1], [0], [0], [1], [0, 0, 1, 1], [], []>} : vector<64x16xbf16>, vector<16x128xbf16>, vector<64x128xf32> -> vector<64x128xf32>
    %c0_3 = arith.constant 0 : index
    %c0_4 = arith.constant 0 : index
    %3 = vector.load %arg3[%c0_3, %c0_4] : memref<1x128xf32, #tpu.memory_space<vmem>>, vector<1x128xf32>
    %4 = vector.broadcast %3 : vector<1x128xf32> to vector<64x128xf32>
    %5 = arith.addf %2, %4 : vector<64x128xf32>
    %c0_5 = arith.constant 0 : index
    %c0_6 = arith.constant 0 : index
    %6 = vector.load %arg4[%c0_5, %c0_6] : memref<64x128xf32, #tpu.memory_space<vmem>>, vector<64x128xf32>
    tpu.vector_store %arg4[%c0_5, %c0_6], %5 {strides = array<i32>} : memref<64x128xf32, #tpu.memory_space<vmem>>, vector<64x128xf32>,
    return
  }
  func.func @transform_0(%arg0: i32) -> (i32, i32) {
    %c0_i32 = arith.constant 0 : i32
    %c0_i32_0 = arith.constant 0 : i32
    return %arg0, %c0_i32 : i32, i32
  }
  func.func @transform_1(%arg0: i32) -> (i32, i32) {
    %c0_i32 = arith.constant 0 : i32
    %c0_i32_0 = arith.constant 0 : i32
    %c0_i32_1 = arith.constant 0 : i32
    return %c0_i32, %c0_i32_0 : i32, i32
  }
  func.func @transform_2(%arg0: i32) -> (i32, i32) {
    %c0_i32 = arith.constant 0 : i32
    %c0_i32_0 = arith.constant 0 : i32
    %c0_i32_1 = arith.constant 0 : i32
    return %c0_i32, %c0_i32_0 : i32, i32
  }
  func.func @transform_3(%arg0: i32) -> (i32, i32) {
    %c0_i32 = arith.constant 0 : i32
    %c0_i32_0 = arith.constant 0 : i32
    return %arg0, %c0_i32 : i32, i32
  }
}

</mosaic_0001>

<bundles_post_ra>
// kernel: tpu_custom_call.1
= control target key start
LH: loop header
LB: loop body
LE: loop exit
PB: predicated region body
PF: predicated region fallthrough
CT: control target
= control target key end

     0   :  { %vm59_vm0 = vcmask 130048   ;;  %s273_s0 = inlined_call_operand.vmem [shape: bf16[64,16], index: 0, kind: input, shape index: {}]   ;;  %s274_s1 = inlined_call_operand.vmem [shape: bf16[16,128], index: 1, kind: input, shape index: {}]   ;;  %s275_s2 = inlined_call_operand.vmem [shape: f32[1,128], index: 2, kind: input, shape index: {}]   ;;  %s276_s3 = inlined_call_operand.hbm [shape: f32[64,128], index: 3, kind: output, shape index: {}]  }
   0x1   :  { %v191_v0 = vld [vmem:[%s274_s1] sm:$0xff]   ;;  %v193_v2 = vld [vmem:[%s273_s0 + $0x10] sm:$0xff]   ;;  %v194_v3 = vld [vmem:[%s273_s0 + $0x8] sm:$0xff]  }
   0x2   :  { %v192_v1 = vld [vmem:[%s273_s0] sm:$0xff]   ;;  %176 = vmatprep.subr.bf16.mxu0 %v191_v0  ;;  %186 = vmatprep.subr.bf16.mxu1 %v191_v0  ;;  %v195_v4 = vld [vmem:[%s273_s0 + $0x18] sm:$0xff]  }
   0x3   :  { %177 = vmatpush3.bf16.msra.mxu0 %v191_v0  ;;  %187 = vmatpush3.bf16.msra.mxu1 %v191_v0 }
   0x4   :  { %178 = vmatprep.mubr.msk.bf16.mxu0 %vm59_vm0, %v192_v1  ;;  %182 = vmatprep.mubr.msk.bf16.mxu1 %vm59_vm0, %v193_v2 }
   0x5   :  { %8 = vsyncpa [#allocation3], 0  ;;  %v161_v5 = vld [vmem:[%s275_s2] ss:$0 sm:$0xff]  ;;  %s220_s23 = smov [#allocation2]  }
   0x6   :  { %179 = vmatmul.mubr.msk.bf16.vlgmr.msra.gmra.mrb[0].mxu0 %vm59_vm0, %v194_v3  ;;  %183 = vmatmul.mubr.msk.bf16.vlgmr.msra.gmra.mrb[0].mxu1 %vm59_vm0, %v195_v4  ;;  %s150_s24 = sshll.u32 %s220_s23, 4  ;;  %s151_s24 = int_to_ptr.vmem [resolvable:$true] %s150_s24 }
   0x7   :  { %s196_s0 = scalar_lea.vmem %s151_s24, 1024  ;;  %p201_p1 = scmp.lt.s32.totalorder %s151_s24, %s151_s24 }
   0x8   :  { %p197_p0 = scmp.ne.s32.totalorder %s151_s24, %s196_s0  ;;  %p202_p2 = scmp.lt.s32.totalorder %s196_s0, %s196_s0 }
   0xa   :  { %p203_p3 = por %p202_p2, %p201_p1 }
   0xc   :  { %p204_p4 = pnand %p203_p3, %p197_p0 }
  0xd9   :  { %v180_v6 = vpop.f32.mrb[0].mxu0  ;;  %v184_v7 = vpop.f32.mrb[0].mxu1 }
  0xda   :  { %v115_v8 = vadd.f32 %v180_v6, %v161_v5  ;;  %v131_v9 = vadd.f32 %v184_v7, %v161_v5  ;;  %v106_v10 = vpop.f32.mrb[1].mxu0  ;;  %v122_v11 = vpop.f32.mrb[1].mxu1 }
  0xdb   :  { %v107_v12 = vadd.f32 %v161_v5, %v106_v10  ;;  %v123_v13 = vadd.f32 %v161_v5, %v122_v11  ;;  %v181_v14 = vpop.f32.mrb[2].mxu0  ;;  %v185_v15 = vpop.f32.mrb[2].mxu1 }
  0xdc   :  { %139 = vst [vmem:[#allocation2 + $0x10] sm:$0xff] %v115_v8  ;;  %143 = vst [vmem:[#allocation2 + $0x30] sm:$0xff] %v131_v9  ;;  %v118_v16 = vadd.f32 %v181_v14, %v161_v5  ;;  %v134_v17 = vadd.f32 %v185_v15, %v161_v5  ;;  %v109_v18 = vpop.f32.mrb[3].mxu0  ;;  %v125_v19 = vpop.f32.mrb[3].mxu1 }
  0xdd   :  { %137 = vst [vmem:[#allocation2] sm:$0xff] %v107_v12  ;;  %141 = vst [vmem:[#allocation2 + $0x20] sm:$0xff] %v123_v13  ;;  %v110_v20 = vadd.f32 %v161_v5, %v109_v18  ;;  %v126_v21 = vadd.f32 %v161_v5, %v125_v19 }
  0xde   :  { %140 = vst [vmem:[#allocation2 + $0x18] sm:$0xff] %v118_v16  ;;  %144 = vst [vmem:[#allocation2 + $0x38] sm:$0xff] %v134_v17 }
  0xdf   :  { %138 = vst [vmem:[#allocation2 + $0x8] sm:$0xff] %v110_v20  ;;  %142 = vst [vmem:[#allocation2 + $0x28] sm:$0xff] %v126_v21 }
  0xe0   :  { %207 = shalt.err (!%p204_p4)
}
  0xe1   :  { %s208_s26 = scalar_lea.hbm %s276_s3, 1024 }
  0xe2   :  { %p209_p5 = scmp.ne.s32.totalorder %s276_s3, %s208_s26  ;;  %p212_p6 = scmp.lt.u32.totalorder %s208_s26, %s276_s3 }
  0xe4   :  { %p214_p7 = pnand %p212_p6, %p209_p5 }
  0xe6   :  { %217 = shalt.err (!%p214_p7)
}
  0xe7   :  { %s221_s4 = smov 128   ;;  %s222_s5 = smov 8  }
  0xe8   :  { %156 = dma.vmem_to_hbm [thread:$0]  %s151_s24, 1024, %s276_s3, [#allocation3], %s221_s4, %s221_s4, %s222_s5  }
  0xe9   :  { %218 = dma.done.wait [#allocation3], 1024  }
  0xea   :  { %219 = vsyncadd [#allocation3], 4294966272 }
  0xeb   :  { %160 = vsyncpa [#allocation3], 1 }

</bundles_post_ra>
